<compile_context>
chip_gen: v6e
topology: v6e:2x2x1
jax: 0.10.0
libtpu: 0.0.40
codegen_flags: <defaults>
</compile_context>

<pallas_src>
import functools
import math

import jax
import jax.numpy as jnp
from jax.experimental import pallas as pl
from jax.experimental.pallas import tpu as pltpu

EPS = 1e-5  # PyTorch nn.LayerNorm default


def _layernorm(x, w, b):
    mu = jnp.mean(x, axis=-1, keepdims=True)
    var = jnp.mean((x - mu) ** 2, axis=-1, keepdims=True)
    return (x - mu) * jax.lax.rsqrt(var + EPS) * w + b


def sa_ff_kernel(x_ref,
                 ln_ref,                           # packed (4, D): ln0_w, ln0_b, ffln_w, ffln_b
                 wq_ref, wk_ref, wv_ref,           # attention adaptor, pre-split (bf16)
                 w_out_ref,                        # attention output projection (bf16)
                 ff_w1_ref, ff_b1_ref, ff_w2_ref,  # FF weights (bf16) + bias (f32)
                 o_ref,
                 *, num_head, attn_dim, head_major):
    f32 = jnp.float32
    bf16 = jnp.bfloat16

    x = x_ref[0].astype(f32)                        # (S, D)
    S = x.shape[0]
    hsize = num_head * attn_dim

    # _inputs = self.layer_normer(inputs)            (f32 statistics)
    xn = _layernorm(x, ln_ref[0], ln_ref[1])        # (S, D) f32
    xn_b = xn.astype(bf16)

    # --- SelfAttn (head-batched) ---
    scale = 1.0 / math.sqrt(attn_dim)
    if head_major:
        # Weights arrive head-major: (H, D, A).  Q/K/V are produced directly in (H, S, A)
        # layout -> no activation transposes / lane-splitting reshapes in the kernel.
        qh = (jnp.einsum('sd,hda->hsa', xn_b, wq_ref[...],
                         preferred_element_type=f32) * scale).astype(bf16)
        kh = jnp.einsum('sd,hda->hsa', xn_b, wk_ref[...],
                        preferred_element_type=f32).astype(bf16)
        vh = jnp.einsum('sd,hda->hsa', xn_b, wv_ref[...],
                        preferred_element_type=f32).astype(bf16)
    else:
        # attn_dim < 128: a per-head projection would leave the MXU N-dim mostly idle, so
        # keep one wide (S,D)@(D,hsize) matmul per Q/K/V and relayout to head-major.
        q = jnp.dot(xn_b, wq_ref[...], preferred_element_type=f32) * scale  # (S, hsize)
        k = jnp.dot(xn_b, wk_ref[...], preferred_element_type=f32)
        v = jnp.dot(xn_b, wv_ref[...], preferred_element_type=f32)
        qh = jnp.transpose(q.reshape(S, num_head, attn_dim), (1, 0, 2)).astype(bf16)
        kh = jnp.transpose(k.reshape(S, num_head, attn_dim), (1, 0, 2)).astype(bf16)
        vh = jnp.transpose(v.reshape(S, num_head, attn_dim), (1, 0, 2)).astype(bf16)

    # scores[h,q,k] = sum_a Q[h,q,a] * K[h,k,a]      (batched over heads, no K^T)
    scores = jnp.einsum('hqa,hka->hqk', qh, kh,
                        preferred_element_type=f32)                      # (H,S,S) f32

    m = jnp.max(scores, axis=-1, keepdims=True)
    e = jnp.exp(scores - m)
    denom = jnp.sum(e, axis=-1, keepdims=True)
    p = e * pl.reciprocal(denom, approx=True)                            # softmax (f32)

    ctx = jnp.einsum('hqk,hka->hqa', p.astype(bf16), vh,
                     preferred_element_type=f32)                         # (H,S,A) f32

    if head_major:
        # W_out arrives as (H, A, D): contract heads and attn_dim in one batched matmul,
        # no (H,S,A)->(S,hsize) relayout of the context.
        context = jnp.einsum('hsa,had->sd', ctx.astype(bf16), w_out_ref[...],
                             preferred_element_type=f32) + xn            # (S, D) f32
    else:
        oma = jnp.transpose(ctx, (1, 0, 2)).reshape(S, hsize)            # (S, hsize)
        context = jnp.dot(oma.astype(bf16), w_out_ref[...],
                          preferred_element_type=f32) + xn               # (S, D) f32

    # --- PositionwiseFF ---
    cn = _layernorm(context, ln_ref[2], ln_ref[3])                       # (S, D) f32
    hid = jnp.dot(cn.astype(bf16), ff_w1_ref[...],
                  preferred_element_type=f32) + ff_b1_ref[0]             # (S, fhsize)
    # tanh-form GELU: transcendental goes to the EUP slot (nearly free) instead of a long
    # erf VPU polynomial; ~1e-3 shift vs torch's exact GELU, inside the test tolerance.
    hid = jax.nn.gelu(hid, approximate=True)
    out = jnp.dot(hid.astype(bf16), ff_w2_ref[...],
                  preferred_element_type=f32) + cn                       # (S, D) f32

    o_ref[0] = out.astype(o_ref.dtype)


def sa_ff_layer(x, params, num_head):
    B, S, D = x.shape
    hsize = params["w_adp"].shape[1] // 3
    attn_dim = hsize // num_head
    fhsize = params["ff_w1"].shape[1]
    bf16 = jnp.bfloat16

    # Head-major weight relayout only pays off when each head's output is lane-dense.
    head_major = (attn_dim % 128 == 0) and (attn_dim >= 128)

    # Split the fused QKV adaptor into three weights in the wrapper so the kernel never
    # slices the lane axis; cast MXU weight operands to bf16 (halves weight VMEM / DMA).
    w_adp = params["w_adp"]
    wq = w_adp[:, :hsize].astype(bf16)
    wk = w_adp[:, hsize:2 * hsize].astype(bf16)
    wv = w_adp[:, 2 * hsize:].astype(bf16)
    w_out = params["w_out"].astype(bf16)
    if head_major:
        # One-time, weight-side relayout (free relative to per-step activation transposes).
        wq = wq.reshape(D, num_head, attn_dim).transpose(1, 0, 2)        # (H, D, A)
        wk = wk.reshape(D, num_head, attn_dim).transpose(1, 0, 2)
        wv = wv.reshape(D, num_head, attn_dim).transpose(1, 0, 2)
        w_out = w_out.reshape(num_head, attn_dim, D)                     # (H, A, D)
    ff_w1 = params["ff_w1"].astype(bf16)
    ff_w2 = params["ff_w2"].astype(bf16)

    # Pack the four tiny (1, D) LayerNorm params into a single (4, D) input -> one DMA.
    ln_params = jnp.concatenate(
        [params["ln0_w"], params["ln0_b"], params["ffln_w"], params["ffln_b"]], axis=0)

    def resident(shape):
        # Constant index map -> fetched once and kept resident; single-buffered so the
        # weights don't pay the default 2x double-buffering VMEM cost.
        return pl.BlockSpec(shape, lambda b: (0,) * len(shape),
                            pipeline_mode=pl.Buffered(1))

    # --- VMEM budget (generation aware) ---
    weight_bytes = 2 * (3 * D * hsize + hsize * D + D * fhsize + fhsize * D)   # bf16, 1-buf
    param_bytes = 4 * (4 * D + fhsize)                                         # f32 LN/bias
    act_bytes = 4 * (2 * 2 * S * D                        # double-buffered x & out blocks
                     + 6 * S * hsize                      # q,k,v + head-major relayouts
                     + 3 * num_head * S * S               # scores, e, p (live together)
                     + 2 * S * hsize                      # ctx + oma
                     + 3 * S * D + 2 * S * fhsize)        # context, cn, out, hid(s)
    need = weight_bytes + param_bytes + act_bytes
    try:
        vmem_cap = pltpu.get_tpu_info().vmem_capacity_bytes
    except Exception:
        vmem_cap = 64 * 1024 * 1024                       # conservative (v7x per-TC)
    # ~2x static estimate for compiler scratch / temporaries, capped at 80% of physical.
    vmem_limit = int(min(max(2 * need, 16 * 1024 * 1024), int(0.8 * vmem_cap)))

    flops = 2 * B * S * (D * 3 * hsize        # QKV projection
                         + 2 * S * hsize      # QK^T + PV (all heads)
                         + hsize * D          # output projection
                         + 2 * D * fhsize)    # FF matmuls
    transcendentals = B * num_head * S * S + B * S * fhsize          # exp + gelu(tanh)
    bytes_accessed = 2 * B * S * D * x.dtype.itemsize + weight_bytes + param_bytes

    kernel = functools.partial(sa_ff_kernel, num_head=num_head, attn_dim=attn_dim,
                               head_major=head_major)
    return pl.pallas_call(
        kernel,
        out_shape=jax.ShapeDtypeStruct((B, S, D), x.dtype),
        grid=(B,),
        in_specs=[
            pl.BlockSpec((1, S, D), lambda b: (b, 0, 0)),    # x: one batch element / step
            resident(ln_params.shape),                       # packed LayerNorm params
            resident(wq.shape), resident(wk.shape), resident(wv.shape),
            resident(w_out.shape),
            resident(ff_w1.shape), resident((1, fhsize)), resident(ff_w2.shape),
        ],
        out_specs=pl.BlockSpec((1, S, D), lambda b: (b, 0, 0)),
        compiler_params=pltpu.CompilerParams(
            dimension_semantics=("parallel",),               # megacore: split batch steps
            vmem_limit_bytes=vmem_limit),
        cost_estimate=pl.CostEstimate(flops=flops,
                                      transcendentals=transcendentals,
                                      bytes_accessed=bytes_accessed),
    )(x, ln_params, wq, wk, wv, w_out, ff_w1, params["ff_b1"], ff_w2)


def reference(x, params, num_head):
    """Pure-JAX f32 reference mirroring the PyTorch forward (eval mode)."""
    B, S, D = x.shape
    hsize = params["w_adp"].shape[1] // 3
    adim = hsize // num_head

    def ln(t, w, b):
        mu = t.mean(-1, keepdims=True)
        var = ((t - mu) ** 2).mean(-1, keepdims=True)
        return (t - mu) / jnp.sqrt(var + EPS) * w + b

    xn = ln(x, params["ln0_w"][0], params["ln0_b"][0])
    qkv = (xn @ params["w_adp"]).reshape(B, S, 3, num_head, adim)
    q = qkv[:, :, 0].transpose(0, 2, 1, 3)
    k = qkv[:, :, 1].transpose(0, 2, 1, 3)
    v = qkv[:, :, 2].transpose(0, 2, 1, 3)
    sc = jnp.einsum('bhqd,bhkd->bhqk', q, k) / math.sqrt(adim)
    p = jax.nn.softmax(sc, axis=-1)
    oma = jnp.einsum('bhqk,bhkd->bhqd', p, v).transpose(0, 2, 1, 3).reshape(B, S, hsize)
    ctx = oma @ params["w_out"] + xn
    cn = ln(ctx, params["ffln_w"][0], params["ffln_b"][0])
    hid = jax.nn.gelu(cn @ params["ff_w1"] + params["ff_b1"][0], approximate=False)
    return hid @ params["ff_w2"] + cn


if __name__ == "__main__":
    # Module config: isize=32, ahsize=None -> 32, fhsize=None -> 128, num_head=2
    B, S, D = 2, 8, 32
    num_head = 2
    hsize = D                       # ahsize defaults to isize
    fhsize = hsize * 4

    key = jax.random.PRNGKey(0)
    ks = jax.random.split(key, 9)
    f32 = jnp.float32
    params = {
        "ln0_w": 1.0 + 0.1 * jax.random.normal(ks[0], (1, D), f32),
        "ln0_b": 0.1 * jax.random.normal(ks[1], (1, D), f32),
        # Linear weights stored pre-transposed: (in, out) so kernel does x @ W.
        "w_adp": 0.05 * jax.random.normal(ks[2], (D, 3 * hsize), f32),
        "w_out": 0.05 * jax.random.normal(ks[3], (hsize, D), f32),
        "ffln_w": 1.0 + 0.1 * jax.random.normal(ks[4], (1, D), f32),
        "ffln_b": 0.1 * jax.random.normal(ks[5], (1, D), f32),
        "ff_w1": 0.05 * jax.random.normal(ks[6], (D, fhsize), f32),
        "ff_b1": 0.05 * jax.random.normal(ks[7], (1, fhsize), f32),
        "ff_w2": 0.05 * jax.random.normal(ks[8], (fhsize, D), f32),
    }
    x = jax.random.normal(jax.random.PRNGKey(1), (B, S, D), f32)

    out = sa_ff_layer(x, params, num_head)
    out = jax.block_until_ready(out)

    ref = reference(x, params, num_head)
    assert out.shape == (B, S, D)
    # bf16 MXU operands + approximate reciprocal + tanh GELU -> bf16-level tolerance.
    err = jnp.max(jnp.abs(out - ref))
    assert jnp.allclose(out, ref, atol=2e-2, rtol=2e-2), f"max abs err {err}"
    print("KERNEL_OK")
</pallas_src>

<mosaic_0001>
module attributes {stable_mosaic.version = 11 : i64} {
  func.func @sa_ff_kernel(%arg0: i32, %arg1: memref<1x8x32xf32, #tpu.memory_space<vmem>>, %arg2: memref<4x32xf32, #tpu.memory_space<vmem>>, %arg3: memref<32x32xbf16, #tpu.memory_space<vmem>>, %arg4: memref<32x32xbf16, #tpu.memory_space<vmem>>, %arg5: memref<32x32xbf16, #tpu.memory_space<vmem>>, %arg6: memref<32x32xbf16, #tpu.memory_space<vmem>>, %arg7: memref<32x128xbf16, #tpu.memory_space<vmem>>, %arg8: memref<1x128xf32, #tpu.memory_space<vmem>>, %arg9: memref<128x32xbf16, #tpu.memory_space<vmem>>, %arg10: memref<1x8x32xf32, #tpu.memory_space<vmem>>) attributes {dimension_semantics = [#tpu.dimension_semantics<parallel>], iteration_bounds = array<i64: 2>, scalar_prefetch = 0 : i64, scratch_operands = 0 : i64, tpu.core_type = #tpu.core_type<tc>, window_params = [{transform_indices = @transform_0, window_bounds = array<i64: 1, 8, 32>}, {pipeline_mode = #tpu.pipeline_mode<synchronous>, transform_indices = @transform_1, window_bounds = array<i64: 4, 32>}, {pipeline_mode = #tpu.pipeline_mode<synchronous>, transform_indices = @transform_2, window_bounds = array<i64: 32, 32>}, {pipeline_mode = #tpu.pipeline_mode<synchronous>, transform_indices = @transform_3, window_bounds = array<i64: 32, 32>}, {pipeline_mode = #tpu.pipeline_mode<synchronous>, transform_indices = @transform_4, window_bounds = array<i64: 32, 32>}, {pipeline_mode = #tpu.pipeline_mode<synchronous>, transform_indices = @transform_5, window_bounds = array<i64: 32, 32>}, {pipeline_mode = #tpu.pipeline_mode<synchronous>, transform_indices = @transform_6, window_bounds = array<i64: 32, 128>}, {pipeline_mode = #tpu.pipeline_mode<synchronous>, transform_indices = @transform_7, window_bounds = array<i64: 1, 128>}, {pipeline_mode = #tpu.pipeline_mode<synchronous>, transform_indices = @transform_8, window_bounds = array<i64: 128, 32>}, {transform_indices = @transform_9, window_bounds = array<i64: 1, 8, 32>}]} {
    %c0 = arith.constant 0 : index
    %c0_0 = arith.constant 0 : index
    %c0_1 = arith.constant 0 : index
    %0 = vector.load %arg1[%c0, %c0_0, %c0_1] : memref<1x8x32xf32, #tpu.memory_space<vmem>>, vector<1x8x32xf32>
    %1 = vector.shape_cast %0 : vector<1x8x32xf32> to vector<8x32xf32>
    %c0_2 = arith.constant 0 : index
    %c0_3 = arith.constant 0 : index
    %2 = vector.load %arg2[%c0_2, %c0_3] : memref<4x32xf32, #tpu.memory_space<vmem>>, vector<1x32xf32>
    %3 = vector.shape_cast %2 : vector<1x32xf32> to vector<32xf32>
    %c1 = arith.constant 1 : index
    %c0_4 = arith.constant 0 : index
    %4 = vector.load %arg2[%c1, %c0_4] : memref<4x32xf32, #tpu.memory_space<vmem>>, vector<1x32xf32>
    %5 = vector.shape_cast %4 : vector<1x32xf32> to vector<32xf32>
    %cst = arith.constant dense<0.000000e+00> : vector<8xf32>
    %6 = vector.multi_reduction <add>, %1, %cst [1] : vector<8x32xf32> to vector<8xf32>
    %7 = vector.shape_cast %6 : vector<8xf32> to vector<8x1xf32>
    %cst_5 = arith.constant 3.200000e+01 : f32
    %8 = vector.broadcast %cst_5 : f32 to vector<8x1xf32>
    %9 = arith.divf %7, %8 : vector<8x1xf32>
    %10 = vector.broadcast %9 : vector<8x1xf32> to vector<8x32xf32>
    %11 = arith.subf %1, %10 : vector<8x32xf32>
    %12 = arith.mulf %11, %11 : vector<8x32xf32>
    %cst_6 = arith.constant dense<0.000000e+00> : vector<8xf32>
    %13 = vector.multi_reduction <add>, %12, %cst_6 [1] : vector<8x32xf32> to vector<8xf32>
    %14 = vector.shape_cast %13 : vector<8xf32> to vector<8x1xf32>
    %cst_7 = arith.constant 3.200000e+01 : f32
    %15 = vector.broadcast %cst_7 : f32 to vector<8x1xf32>
    %16 = arith.divf %14, %15 : vector<8x1xf32>
    %17 = vector.broadcast %9 : vector<8x1xf32> to vector<8x32xf32>
    %18 = arith.subf %1, %17 : vector<8x32xf32>
    %cst_8 = arith.constant 9.99999974E-6 : f32
    %19 = vector.broadcast %cst_8 : f32 to vector<8x1xf32>
    %20 = arith.addf %16, %19 : vector<8x1xf32>
    %21 = math.rsqrt %20 : vector<8x1xf32>
    %22 = vector.broadcast %21 : vector<8x1xf32> to vector<8x32xf32>
    %23 = arith.mulf %18, %22 : vector<8x32xf32>
    %24 = vector.shape_cast %3 : vector<32xf32> to vector<1x32xf32>
    %25 = vector.broadcast %24 : vector<1x32xf32> to vector<8x32xf32>
    %26 = arith.mulf %23, %25 : vector<8x32xf32>
    %27 = vector.shape_cast %5 : vector<32xf32> to vector<1x32xf32>
    %28 = vector.broadcast %27 : vector<1x32xf32> to vector<8x32xf32>
    %29 = arith.addf %26, %28 : vector<8x32xf32>
    %30 = arith.truncf %29 : vector<8x32xf32> to vector<8x32xbf16>
    %c0_9 = arith.constant 0 : index
    %c0_10 = arith.constant 0 : index
    %31 = vector.load %arg3[%c0_9, %c0_10] : memref<32x32xbf16, #tpu.memory_space<vmem>>, vector<32x32xbf16>
    %cst_11 = arith.constant dense<0.000000e+00> : vector<8x32xf32>
    %32 = tpu.matmul %30, %31, %cst_11 {dimension_numbers = #tpu.dot_dimension_numbers<[1], [0], [0], [1], [0, 0, 1, 1], [], []>} : vector<8x32xbf16>, vector<32x32xbf16>, vector<8x32xf32> -> vector<8x32xf32>
    %cst_12 = arith.constant 2.500000e-01 : f32
    %33 = vector.broadcast %cst_12 : f32 to vector<8x32xf32>
    %34 = arith.mulf %32, %33 : vector<8x32xf32>
    %c0_13 = arith.constant 0 : index
    %c0_14 = arith.constant 0 : index
    %35 = vector.load %arg4[%c0_13, %c0_14] : memref<32x32xbf16, #tpu.memory_space<vmem>>, vector<32x32xbf16>
    %cst_15 = arith.constant dense<0.000000e+00> : vector<8x32xf32>
    %36 = tpu.matmul %30, %35, %cst_15 {dimension_numbers = #tpu.dot_dimension_numbers<[1], [0], [0], [1], [0, 0, 1, 1], [], []>} : vector<8x32xbf16>, vector<32x32xbf16>, vector<8x32xf32> -> vector<8x32xf32>
    %c0_16 = arith.constant 0 : index
    %c0_17 = arith.constant 0 : index
    %37 = vector.load %arg5[%c0_16, %c0_17] : memref<32x32xbf16, #tpu.memory_space<vmem>>, vector<32x32xbf16>
    %cst_18 = arith.constant dense<0.000000e+00> : vector<8x32xf32>
    %38 = tpu.matmul %30, %37, %cst_18 {dimension_numbers = #tpu.dot_dimension_numbers<[1], [0], [0], [1], [0, 0, 1, 1], [], []>} : vector<8x32xbf16>, vector<32x32xbf16>, vector<8x32xf32> -> vector<8x32xf32>
    %39 = vector.shape_cast %34 : vector<8x32xf32> to vector<8x2x16xf32>
    %40 = tpu.transpose %39, [1, 0, 2] : vector<8x2x16xf32> -> vector<2x8x16xf32>
    %41 = arith.truncf %40 : vector<2x8x16xf32> to vector<2x8x16xbf16>
    %42 = vector.shape_cast %36 : vector<8x32xf32> to vector<8x2x16xf32>
    %43 = tpu.transpose %42, [1, 0, 2] : vector<8x2x16xf32> -> vector<2x8x16xf32>
    %44 = arith.truncf %43 : vector<2x8x16xf32> to vector<2x8x16xbf16>
    %45 = vector.shape_cast %38 : vector<8x32xf32> to vector<8x2x16xf32>
    %46 = tpu.transpose %45, [1, 0, 2] : vector<8x2x16xf32> -> vector<2x8x16xf32>
    %47 = arith.truncf %46 : vector<2x8x16xf32> to vector<2x8x16xbf16>
    "tpu.trace_start"() <{level = 10 : i32, message = "hqa,hka->hqk"}> : () -> ()
    %cst_19 = arith.constant dense<0.000000e+00> : vector<2x8x8xf32>
    %48 = tpu.matmul %41, %44, %cst_19 {dimension_numbers = #tpu.dot_dimension_numbers<[2], [2], [1], [1], [0, 0, 0, 1, 1, 1], [0], [0]>} : vector<2x8x16xbf16>, vector<2x8x16xbf16>, vector<2x8x8xf32> -> vector<2x8x8xf32>
    "tpu.trace_stop"() : () -> ()
    %cst_20 = arith.constant dense<0xFF800000> : vector<2x8xf32>
    %49 = vector.multi_reduction <maximumf>, %48, %cst_20 [2] : vector<2x8x8xf32> to vector<2x8xf32>
    %50 = vector.shape_cast %49 : vector<2x8xf32> to vector<2x8x1xf32>
    %51 = vector.broadcast %50 : vector<2x8x1xf32> to vector<2x8x8xf32>
    %52 = arith.subf %48, %51 : vector<2x8x8xf32>
    %53 = math.exp %52 : vector<2x8x8xf32>
    %cst_21 = arith.constant dense<0.000000e+00> : vector<2x8xf32>
    %54 = vector.multi_reduction <add>, %53, %cst_21 [2] : vector<2x8x8xf32> to vector<2x8xf32>
    %55 = vector.shape_cast %54 : vector<2x8xf32> to vector<2x8x1xf32>
    %56 = tpu.reciprocal %55 {approx = true} : vector<2x8x1xf32> -> vector<2x8x1xf32>
    %57 = vector.broadcast %56 : vector<2x8x1xf32> to vector<2x8x8xf32>
    %58 = arith.mulf %53, %57 : vector<2x8x8xf32>
    %59 = arith.truncf %58 : vector<2x8x8xf32> to vector<2x8x8xbf16>
    "tpu.trace_start"() <{level = 10 : i32, message = "hqk,hka->hqa"}> : () -> ()
    %cst_22 = arith.constant dense<0.000000e+00> : vector<2x8x16xf32>
    %60 = tpu.matmul %59, %47, %cst_22 {dimension_numbers = #tpu.dot_dimension_numbers<[2], [1], [1], [2], [0, 0, 0, 1, 1, 2], [0], [0]>} : vector<2x8x8xbf16>, vector<2x8x16xbf16>, vector<2x8x16xf32> -> vector<2x8x16xf32>
    "tpu.trace_stop"() : () -> ()
    %61 = tpu.transpose %60, [1, 0, 2] : vector<2x8x16xf32> -> vector<8x2x16xf32>
    %62 = vector.shape_cast %61 : vector<8x2x16xf32> to vector<8x32xf32>
    %63 = arith.truncf %62 : vector<8x32xf32> to vector<8x32xbf16>
    %c0_23 = arith.constant 0 : index
    %c0_24 = arith.constant 0 : index
    %64 = vector.load %arg6[%c0_23, %c0_24] : memref<32x32xbf16, #tpu.memory_space<vmem>>, vector<32x32xbf16>
    %cst_25 = arith.constant dense<0.000000e+00> : vector<8x32xf32>
    %65 = tpu.matmul %63, %64, %cst_25 {dimension_numbers = #tpu.dot_dimension_numbers<[1], [0], [0], [1], [0, 0, 1, 1], [], []>} : vector<8x32xbf16>, vector<32x32xbf16>, vector<8x32xf32> -> vector<8x32xf32>
    %66 = arith.addf %65, %29 : vector<8x32xf32>
    %c2 = arith.constant 2 : index
    %c0_26 = arith.constant 0 : index
    %67 = vector.load %arg2[%c2, %c0_26] : memref<4x32xf32, #tpu.memory_space<vmem>>, vector<1x32xf32>
    %68 = vector.shape_cast %67 : vector<1x32xf32> to vector<32xf32>
    %c3 = arith.constant 3 : index
    %c0_27 = arith.constant 0 : index
    %69 = vector.load %arg2[%c3, %c0_27] : memref<4x32xf32, #tpu.memory_space<vmem>>, vector<1x32xf32>
    %70 = vector.shape_cast %69 : vector<1x32xf32> to vector<32xf32>
    %cst_28 = arith.constant dense<0.000000e+00> : vector<8xf32>
    %71 = vector.multi_reduction <add>, %66, %cst_28 [1] : vector<8x32xf32> to vector<8xf32>
    %72 = vector.shape_cast %71 : vector<8xf32> to vector<8x1xf32>
    %cst_29 = arith.constant 3.200000e+01 : f32
    %73 = vector.broadcast %cst_29 : f32 to vector<8x1xf32>
    %74 = arith.divf %72, %73 : vector<8x1xf32>
    %75 = vector.broadcast %74 : vector<8x1xf32> to vector<8x32xf32>
    %76 = arith.subf %66, %75 : vector<8x32xf32>
    %77 = arith.mulf %76, %76 : vector<8x32xf32>
    %cst_30 = arith.constant dense<0.000000e+00> : vector<8xf32>
    %78 = vector.multi_reduction <add>, %77, %cst_30 [1] : vector<8x32xf32> to vector<8xf32>
    %79 = vector.shape_cast %78 : vector<8xf32> to vector<8x1xf32>
    %cst_31 = arith.constant 3.200000e+01 : f32
    %80 = vector.broadcast %cst_31 : f32 to vector<8x1xf32>
    %81 = arith.divf %79, %80 : vector<8x1xf32>
    %82 = vector.broadcast %74 : vector<8x1xf32> to vector<8x32xf32>
    %83 = arith.subf %66, %82 : vector<8x32xf32>
    %cst_32 = arith.constant 9.99999974E-6 : f32
    %84 = vector.broadcast %cst_32 : f32 to vector<8x1xf32>
    %85 = arith.addf %81, %84 : vector<8x1xf32>
    %86 = math.rsqrt %85 : vector<8x1xf32>
    %87 = vector.broadcast %86 : vector<8x1xf32> to vector<8x32xf32>
    %88 = arith.mulf %83, %87 : vector<8x32xf32>
    %89 = vector.shape_cast %68 : vector<32xf32> to vector<1x32xf32>
    %90 = vector.broadcast %89 : vector<1x32xf32> to vector<8x32xf32>
    %91 = arith.mulf %88, %90 : vector<8x32xf32>
    %92 = vector.shape_cast %70 : vector<32xf32> to vector<1x32xf32>
    %93 = vector.broadcast %92 : vector<1x32xf32> to vector<8x32xf32>
    %94 = arith.addf %91, %93 : vector<8x32xf32>
    %95 = arith.truncf %94 : vector<8x32xf32> to vector<8x32xbf16>
    %c0_33 = arith.constant 0 : index
    %c0_34 = arith.constant 0 : index
    %96 = vector.load %arg7[%c0_33, %c0_34] : memref<32x128xbf16, #tpu.memory_space<vmem>>, vector<32x128xbf16>
    %cst_35 = arith.constant dense<0.000000e+00> : vector<8x128xf32>
    %97 = tpu.matmul %95, %96, %cst_35 {dimension_numbers = #tpu.dot_dimension_numbers<[1], [0], [0], [1], [0, 0, 1, 1], [], []>} : vector<8x32xbf16>, vector<32x128xbf16>, vector<8x128xf32> -> vector<8x128xf32>
    %c0_36 = arith.constant 0 : index
    %c0_37 = arith.constant 0 : index
    %98 = vector.load %arg8[%c0_36, %c0_37] : memref<1x128xf32, #tpu.memory_space<vmem>>, vector<1x128xf32>
    %99 = vector.shape_cast %98 : vector<1x128xf32> to vector<128xf32>
    %100 = vector.shape_cast %99 : vector<128xf32> to vector<1x128xf32>
    %101 = vector.broadcast %100 : vector<1x128xf32> to vector<8x128xf32>
    %102 = arith.addf %97, %101 : vector<8x128xf32>
    %103 = arith.mulf %102, %102 : vector<8x128xf32>
    %104 = arith.mulf %102, %103 : vector<8x128xf32>
    %cst_38 = arith.constant 4.471500e-02 : f32
    %105 = vector.broadcast %cst_38 : f32 to vector<8x128xf32>
    %106 = arith.mulf %105, %104 : vector<8x128xf32>
    %107 = arith.addf %102, %106 : vector<8x128xf32>
    %cst_39 = arith.constant 0.797884583 : f32
    %108 = vector.broadcast %cst_39 : f32 to vector<8x128xf32>
    %109 = arith.mulf %108, %107 : vector<8x128xf32>
    %110 = math.tanh %109 : vector<8x128xf32>
    %cst_40 = arith.constant 1.000000e+00 : f32
    %111 = vector.broadcast %cst_40 : f32 to vector<8x128xf32>
    %112 = arith.addf %111, %110 : vector<8x128xf32>
    %cst_41 = arith.constant 5.000000e-01 : f32
    %113 = vector.broadcast %cst_41 : f32 to vector<8x128xf32>
    %114 = arith.mulf %113, %112 : vector<8x128xf32>
    %115 = arith.mulf %102, %114 : vector<8x128xf32>
    %116 = arith.truncf %115 : vector<8x128xf32> to vector<8x128xbf16>
    %c0_42 = arith.constant 0 : index
    %c0_43 = arith.constant 0 : index
    %117 = vector.load %arg9[%c0_42, %c0_43] : memref<128x32xbf16, #tpu.memory_space<vmem>>, vector<128x32xbf16>
    %cst_44 = arith.constant dense<0.000000e+00> : vector<8x32xf32>
    %118 = tpu.matmul %116, %117, %cst_44 {dimension_numbers = #tpu.dot_dimension_numbers<[1], [0], [0], [1], [0, 0, 1, 1], [], []>} : vector<8x128xbf16>, vector<128x32xbf16>, vector<8x32xf32> -> vector<8x32xf32>
    %119 = arith.addf %118, %94 : vector<8x32xf32>
    %c0_45 = arith.constant 0 : index
    %c0_46 = arith.constant 0 : index
    %c0_47 = arith.constant 0 : index
    %120 = vector.load %arg10[%c0_45, %c0_46, %c0_47] : memref<1x8x32xf32, #tpu.memory_space<vmem>>, vector<1x8x32xf32>
    %121 = vector.shape_cast %120 : vector<1x8x32xf32> to vector<8x32xf32>
    %122 = vector.shape_cast %119 : vector<8x32xf32> to vector<1x8x32xf32>
    tpu.vector_store %arg10[%c0_45, %c0_46, %c0_47], %122 {strides = array<i32>} : memref<1x8x32xf32, #tpu.memory_space<vmem>>, vector<1x8x32xf32>,
    return
  }
  func.func @transform_0(%arg0: i32) -> (i32, i32, i32) {
    %c0_i32 = arith.constant 0 : i32
    %c0_i32_0 = arith.constant 0 : i32
    %c0_i32_1 = arith.constant 0 : i32
    return %arg0, %c0_i32, %c0_i32_0 : i32, i32, i32
  }
  func.func @transform_1(%arg0: i32) -> (i32, i32) {
    %c0_i32 = arith.constant 0 : i32
    %c0_i32_0 = arith.constant 0 : i32
    %c0_i32_1 = arith.constant 0 : i32
    return %c0_i32, %c0_i32_0 : i32, i32
  }
  func.func @transform_2(%arg0: i32) -> (i32, i32) {
    %c0_i32 = arith.constant 0 : i32
    %c0_i32_0 = arith.constant 0 : i32
    %c0_i32_1 = arith.constant 0 : i32
    return %c0_i32, %c0_i32_0 : i32, i32
  }
  func.func @transform_3(%arg0: i32) -> (i32, i32) {
    %c0_i32 = arith.constant 0 : i32
    %c0_i32_0 = arith.constant 0 : i32
    %c0_i32_1 = arith.constant 0 : i32
    return %c0_i32, %c0_i32_0 : i32, i32
  }
  func.func @transform_4(%arg0: i32) -> (i32, i32) {
    %c0_i32 = arith.constant 0 : i32
    %c0_i32_0 = arith.constant 0 : i32
    %c0_i32_1 = arith.constant 0 : i32
    return %c0_i32, %c0_i32_0 : i32, i32
  }
  func.func @transform_5(%arg0: i32) -> (i32, i32) {
    %c0_i32 = arith.constant 0 : i32
    %c0_i32_0 = arith.constant 0 : i32
    %c0_i32_1 = arith.constant 0 : i32
    return %c0_i32, %c0_i32_0 : i32, i32
  }
  func.func @transform_6(%arg0: i32) -> (i32, i32) {
    %c0_i32 = arith.constant 0 : i32
    %c0_i32_0 = arith.constant 0 : i32
    %c0_i32_1 = arith.constant 0 : i32
    return %c0_i32, %c0_i32_0 : i32, i32
  }
  func.func @transform_7(%arg0: i32) -> (i32, i32) {
    %c0_i32 = arith.constant 0 : i32
    %c0_i32_0 = arith.constant 0 : i32
    %c0_i32_1 = arith.constant 0 : i32
    return %c0_i32, %c0_i32_0 : i32, i32
  }
  func.func @transform_8(%arg0: i32) -> (i32, i32) {
    %c0_i32 = arith.constant 0 : i32
    %c0_i32_0 = arith.constant 0 : i32
    %c0_i32_1 = arith.constant 0 : i32
    return %c0_i32, %c0_i32_0 : i32, i32
  }
  func.func @transform_9(%arg0: i32) -> (i32, i32, i32) {
    %c0_i32 = arith.constant 0 : i32
    %c0_i32_0 = arith.constant 0 : i32
    %c0_i32_1 = arith.constant 0 : i32
    return %arg0, %c0_i32, %c0_i32_0 : i32, i32, i32
  }
}

</mosaic_0001>

<bundles_post_ra>
// kernel: tpu_custom_call.1
= control target key start
LH: loop header
LB: loop body
LE: loop exit
PB: predicated region body
PF: predicated region fallthrough
CT: control target
= control target key end

     0   :  { %14 = vsyncpa [#allocation3], 0  ;;  %s2406_s0 = inlined_call_operand.vmem [shape: f32[2,8,32], index: 0, kind: input, shape index: {}]   ;;  %s2407_s1 = inlined_call_operand.hbm [shape: f32[4,32], index: 1, kind: input, shape index: {}]   ;;  %s2408_s2 = inlined_call_operand.vmem [shape: bf16[32,32], index: 2, kind: input, shape index: {}]   ;;  %s2409_s3 = inlined_call_operand.vmem [shape: bf16[32,32], index: 3, kind: input, shape index: {}]   ;;  %s2410_s4 = inlined_call_operand.vmem [shape: bf16[32,32], index: 4, kind: input, shape index: {}]   ;;  %s2411_s5 = inlined_call_operand.vmem [shape: bf16[32,32], index: 5, kind: input, shape index: {}]   ;;  %s2412_s6 = inlined_call_operand.hbm [shape: bf16[32,128], index: 6, kind: input, shape index: {}]   ;;  %s2413_s7 = inlined_call_operand.vmem [shape: f32[1,128], index: 7, kind: input, shape index: {}]   ;;  %s2414_s8 = inlined_call_operand.vmem [shape: bf16[128,32], index: 8, kind: input, shape index: {}]   ;;  %s2415_s9 = inlined_call_operand.hbm [shape: f32[2,8,32], index: 9, kind: output, shape index: {}]  }
   0x1   :  { %15 = vsyncpa [#allocation6], 0 }
   0x2   :  { %16 = vsyncpa [#allocation4], 0 }
   0x3   :  { %18 = vsyncpa [#allocation4 + $0x1], 0  ;;  %s2071_s30 = smov 0   ;;  %s2073_s10 = smov 0  }
   0x4   :  { %s2075_s11 = smov 0   ;;  %s2077_s12 = smov 0  }
   0x5 LB: > { %s2092_s13 = sadd.s32 4294967295, %s2008_s12   ;;  %s1618_s14 = sadd.s32 4294967294, %s2008_s12   ;;  %s2008_s12 = sphi %s2077_s12, %s2433_s12   ;;  %s2004_s11 = sphi %s2075_s11, %s2432_s11   ;;  %s2000_s10 = sphi %s2073_s10, %s2431_s10   ;;  %s1996_s30 = sphi %s2071_s30, %s2430_s30  }
   0x6   : > { %s2096_s15 = sadd.s32 1, %s2008_s12   ;;  %s225_s16 = sadd.s32 1, %s2004_s11 }
   0x7   : > { %s222_s17 = ssub.s32 %s2008_s12, %s2096_s15  ;;  %p235_p0 = scmp.ne.s32.totalorder %s2004_s11, %s2000_s10 }
   0x8   : > { %p223_p1 = scmp.eq.s32.totalorder %s222_s17, 0  ;;  %p236_p2 = scmp.eq.s32.totalorder %s2092_s13, 1 }
   0x9   : > { %p241_p3 = scmp.ne.s32.totalorder %s2000_s10, %s1996_s30  ;;  %p242_p4 = scmp.eq.s32.totalorder %s1618_s14, 1 }
   0xa   : > { %s2107_s18 = scalar_select %p223_p1, %s2004_s11, %s225_s16  }
   0xb   : > { %p2109_p5 = por %p236_p2, %p235_p0  ;;  %p2113_p6 = por %p242_p4, %p241_p3 }
   0xc   : > { %p1619_p7 = scmp.ge.s32.totalorder %s2008_s12, 1  ;;  %p249_p8 = scmp.lt.s32.totalorder %s2008_s12, 3 }
   0xd   : > { %s2419_s19 = scalar_select %p2109_p5, 1, 0 }
   0xe   : > { %s2420_s20 = scalar_select %p2113_p6, 1, 0 }
   0xf   : > { %p2416_p9 = scmp.eq.s32.totalorder %s2092_s13, 0  ;;  %p2120_p10 = pnand %p1619_p7, %p249_p8 }
  0x10   : > { %s2010_s22 = smov [#allocation2]   ;;  %s2011_s24 = smov [#allocation5]  }
  0x11   : > { %s2421_s21 = scalar_select %p2120_p10, 1, 0 }
  0x12   : > { %s262_s23 = sshll.u32 %s2010_s22, 4  ;;  %p1798_p11 = pneg %p2120_p10  ;;  %s263_s23 = int_to_ptr.vmem [resolvable:$true] %s262_s23 }
  0x13   : > { %s284_s25 = sshll.u32 %s2011_s24, 4  ;;  %s1899_s27 = scalar_lea.vmem %s263_s23, 64  ;;  %s285_s25 = int_to_ptr.vmem [resolvable:$true] %s284_s25 }
  0x14   : > { %p2128_p12 = pnand %p2416_p9, %p1798_p11  ;;  %p1900_p0 = scmp.ne.s32.totalorder %s263_s23, %s1899_s27 }
  0x15   : > { %p1907_p3 = scmp.lt.s32.totalorder %s263_s23, %s263_s23  ;;  %p1908_p4 = scmp.lt.s32.totalorder %s1899_s27, %s1899_s27 }
  0x16   : > { %p1890_p13 = pneg %p2128_p12 }
  0x17   : > { %p1909_p7 = por %p1908_p4, %p1907_p3 }
  0x18   : > { %p1902_p1 = pnand %p1900_p0, %p1890_p13 }
  0x1a   : > { %p1903_p2 = pneg %p1902_p1 }
  0x1c   : > { %p1910_p8 = pnand %p1909_p7, %p1903_p2 }
  0x1e   : > { %1913 = shalt.err (!%p1910_p8)
}
  0x1f   : > { %1801 = dma.hbm_to_vmem [thread:$0]  (!%p2128_p12), %s2407_s1, 64, %s263_s23, [#allocation3]  }
  0x20   : > { %s1925_s14 = scalar_lea.vmem %s285_s25, 256  ;;  %p1933_p0 = scmp.lt.s32.totalorder %s285_s25, %s285_s25 }
  0x21   : > { %p1926_p11 = scmp.ne.s32.totalorder %s285_s25, %s1925_s14  ;;  %p1934_p1 = scmp.lt.s32.totalorder %s1925_s14, %s1925_s14 }
  0x23   : > { %p1928_p9 = pnand %p1926_p11, %p1890_p13  ;;  %p1935_p5 = por %p1934_p1, %p1933_p0 }
  0x25   : > { %p1929_p6 = pneg %p1928_p9 }
  0x27   : > { %p1936_p10 = pnand %p1935_p5, %p1929_p6 }
  0x29   : > { %1939 = shalt.err (!%p1936_p10)
}
  0x2a   : > { %s2012_s16 = smov 64   ;;  %s2013_s17 = smov 4  }
  0x2b   : > { %1804 = dma.hbm_to_vmem [thread:$0]  (!%p2128_p12), %s2412_s6, 256, %s285_s25, [#allocation6], %s2012_s16, %s2012_s16, %s2013_s17  }
  0x2c   : > { %p2423_p2 = scmp.ne.s32.totalorder %s2421_s21, 0 }
  0x2d   : > { %p2424_p3 = scmp.eq.s32.totalorder (!%p2423_p2), %s2092_s13, 0 }
  0x2e   : > { %313 = sbr.rel (%p2423_p2) target bundleno = 2507 (0x9cb), region = 56 }
  0x33   : > { %1983 = dma.done.wait (%p2424_p3), [#allocation3], 64   ;;  %p2425_p9 = pmov %p2424_p3 }
  0x34   : > { %p2426_p5 = pmov %p2424_p3 }
  0x35   : > { %1985 = vsyncadd (%p2425_p9), [#allocation3], 4294967232 }
  0x36   : > { %1987 = dma.done.wait (%p2426_p5), [#allocation6], 256   ;;  %p2427_p6 = pmov %p2424_p3 }
  0x37   : > { %p352_p10 = scmp.lt.s32.totalorder %s2092_s13, 1  ;;  %vm360_vm0 = vcmask 261120   ;;  %v1856_v7 = vld [vmem:[%s2408_s2 + $0x8] sm:$0xff]   ;;  %v2014_v8 = vmov 0.0   ;;  %vm2015_vm1 = vmmov 0   ;;  %v1857_v9 = vld [vmem:[%s2408_s2] sm:$0xff]   ;;  %v566_v39 = vlaneseq }
  0x38   : > { %1989 = vsyncadd (%p2427_p6), [#allocation6], 4294967040  ;;  %1704 = vmatprep.subr.bf16.mxu0 %v2014_v8  ;;  %1708 = vmatprep.mubr.msk.bf16.mxu0 %vm2015_vm1, %v2014_v8  ;;  %v1628_v14 = vld [vmem:[#allocation2] ss:$0 sm:$0xff]  ;;  %v1629_v16 = vld [vmem:[#allocation2 + $0x1] ss:$0 sm:$0xff] }
  0x39   : > { %s353_s23 = scalar_select %p352_p10, %s2092_s13, 1  ;;  %1705 = vmatpush3.bf16.msra.mxu0 %v1856_v7  ;;  %1728 = vmatprep.subr.bf16.mxu1 %v2014_v8  ;;  %v1858_v19 = vld [vmem:[%s2409_s3 + $0x8] sm:$0xff]   ;;  %v1859_v21 = vld [vmem:[%s2409_s3] sm:$0xff]   ;;  %v2017_v37 = vmov 1983009808   ;;  %v567_v43 = vshrl.u32 %v566_v39, 7 }
  0x3a   : > { %1706 = vmatprep.subr.bf16.mxu0 %v2014_v8  ;;  %1730 = vmatprep.mubr.msk.bf16.mxu1 %vm2015_vm1, %v2014_v8  ;;  %v1860_v22 = vld [vmem:[%s2410_s4 + $0x8] sm:$0xff]   ;;  %v1861_v23 = vld [vmem:[%s2410_s4] sm:$0xff]   ;;  %s2016_s28 = smov 112   ;;  %v564_v38 = vunpack.c.l.s4 %v2017_v37  ;;  %v2018_v40 = vmov 1934713408   ;;  %vm924_vm2 = vcmask 130048  }
  0x3b   : > { %s1627_s25 = sshll.u32 %s353_s23, 3  ;;  %v595_v41 = vunpack.c.l.s4 %v2018_v40  ;;  %vm1017_vm3 = vcmask 64512   ;;  %vm1045_vm4 = vcmask 1043456   ;;  %s2019_s22 = smov 16  }
  0x3c   : > { %s355_s27 = scalar_lea.vmem %s2406_s0, %s1627_s25  ;;  %v565_v42 = vunpack.c.0.s8 %v564_v38  ;;  %s1669_s14 = sshll.u32 %s2092_s13, 7 }
  0x3d   : > { %v357_v0 = vld [vmem:[%s355_s27] sm:$0xff]  ;;  %1707 = vmatpush3.bf16.msra.mxu0 %v1857_v9  ;;  %v596_v44 = vunpack.c.0.s8 %v595_v41  ;;  %s2364_s23 = scalar_lea.hbm %s2415_s9, %s1669_s14  ;;  %p2428_p13 = scmp.ne.s32.totalorder %s2419_s19, 0 }
  0x3e   : > { %v361_v1 = vsel %vm360_vm0, %v357_v0, 0.0  ;;  %1712 = vmatprep.subr.bf16.mxu0 %v2014_v8  ;;  %v2214_v45 = vsub.s32 %v565_v42, %v567_v43  ;;  %s2020_s26 = smov [#allocation7]  }
  0x3f   : > { %362 = vadd.xlane.f32.xlu0 %v361_v1  ;;  %v2218_v49 = vsub.s32 %v596_v44, %v567_v43  ;;  %s1944_s21 = sshll.u32 %s2020_s26, 4  ;;  %s1945_s21 = int_to_ptr.vmem [resolvable:$false] %s1944_s21 }
  0x40   : > { %s1946_s27 = scalar_lea.vmem %s1945_s21, 256 }
  0xc8   : > { %v363_v2 = vpop.xlane.xlu0 %362 }
  0xc9   : > { %v365_v3 = vmul.f32 0.03125, %v363_v2 }
  0xcb   : > { %v366_v4 = vsub.f32 %v357_v0, %v365_v3 }
  0xcd   : > { %v367_v5 = vmul.f32 %v366_v4, %v366_v4 }
  0xcf   : > { %v368_v6 = vsel %vm360_vm0, %v367_v5, 0.0 }
  0xd0   : > { %369 = vadd.xlane.f32.xlu0 %v368_v6 }
 0x159   : > { %v370_v10 = vpop.xlane.xlu0 %369 }
 0x15a   : > { %v371_v11 = vmul.f32 0.03125, %v370_v10 }
 0x15c   : > { %v372_v12 = vadd.f32 1e-05, %v371_v11 }
 0x15e   : > { %1874 = vrsqrt.f32 %v372_v12 }
 0x16b   : > { %v1875_v13 = vpop.eup %1874 }
 0x16c   : > { %v374_v15 = vmul.f32 %v1875_v13, %v366_v4 }
 0x16e   : > { %v379_v17 = vmul.f32 %v1628_v14, %v374_v15 }
 0x170   : > { %v2181_v18 = vadd.f32 %v1629_v16, %v379_v17 }
 0x172   : > { %v385_v20 = vpack.c.bf16 %v2181_v18, %v2181_v18 }
 0x174   : > { %1709 = vmatmul.mubr.msk.bf16.vlgmr.msra.gmra.mxu0 %vm360_vm0, %v385_v20 }
 0x175   : > { %1713 = vmatpush3.bf16.msra.mxu0 %v1858_v19  ;;  %1716 = vmatprep.mubr.msk.bf16.mxu0 %vm2015_vm1, %v2014_v8 }
 0x176   : > { %1714 = vmatprep.subr.bf16.mxu0 %v2014_v8 }
 0x179   : > { %1715 = vmatpush3.bf16.msra.mxu0 %v1859_v21 }
 0x17a   : > { %1720 = vmatprep.subr.bf16.mxu0 %v2014_v8 }
 0x17c   : > { %1717 = vmatmul.mubr.msk.bf16.vlgmr.msra.gmra.mxu0 %vm360_vm0, %v385_v20 }
 0x17d   : > { %1721 = vmatpush3.bf16.msra.mxu0 %v1860_v22  ;;  %1724 = vmatprep.mubr.msk.bf16.mxu0 %vm2015_vm1, %v2014_v8 }
 0x17e   : > { %1722 = vmatprep.subr.bf16.mxu0 %v2014_v8 }
 0x181   : > { %1723 = vmatpush3.bf16.msra.mxu0 %v1861_v23 }
 0x182   : > { %1734 = vmatprep.subr.bf16.mxu0 %v2014_v8 }
 0x184   : > { %1725 = vmatmul.mubr.msk.bf16.vlgmr.msra.gmra.mxu0 %vm360_vm0, %v385_v20 }
 0x185   : > { %1736 = vmatprep.mubr.msk.bf16.mxu0 %vm2015_vm1, %v2014_v8 }
 0x234   : > { %v439_v24 = vpop.f32.mrf.mxu0 }
 0x235   : > { %v445_v30 = vmul.f32 0.25, %v439_v24 }
 0x236   : > { %v1710_v25 = vpop.f32.mrf.mxu0 }
 0x237   : > { %v562_v56 = vcombine.high %v445_v30, %v2014_v8  ;;  %v569_v62 = vrot.slane %v445_v30, %v2214_v45 }
 0x238   : > { %v442_v26 = vpop.f32.mrf.mxu0 }
 0x239   : > { %v576_v5 = vrot.slane %v562_v56, %v2214_v45 }
 0x23a   : > { %v1711_v27 = vpop.f32.mrf.mxu0 }
 0x23c   : > { %v496_v28 = vpop.f32.mrf.mxu0 }
 0x23d   : > { %681 = vrot.lane.b32.xlu1 %v496_v28, %s2016_s28  ;;  %v684_v46 = vcombine.high %v496_v28, %v2014_v8  ;;  %v691_v48 = vrot.slane %v496_v28, %v2214_v45 }
 0x23e   : > { %v1718_v29 = vpop.f32.mrf.mxu0 }
 0x23f   : > { %v698_v52 = vrot.slane %v684_v46, %v2214_v45 }
 0x240   : > { %v499_v31 = vpop.f32.mrf.mxu0 }
 0x241   : > { %559 = vrot.lane.b32.xlu1 %v445_v30, %s2016_s28 }
 0x242   : > { %v1719_v32 = vpop.f32.mrf.mxu0 }
 0x244   : > { %v2212_v33 = vpop.f32.mrf.mxu0 }
 0x246   : > { %v1726_v34 = vpop.f32.mrf.mxu0 }
 0x248   : > { %v555_v35 = vpop.f32.mrf.mxu0 }
 0x24a   : > { %v1727_v36 = vpop.f32.mrf.mxu0 }
 0x2af   : > { %v682_v47 = vpop.permute.xlu1 %681 }
 0x2b0   : > { %v699_v50 = vcombine.high %v682_v47, %v2014_v8  ;;  %v706_v51 = vrot.slane %v682_v47, %v2214_v45 }
 0x2b2   : > { %v713_v53 = vrot.slane %v699_v50, %v2214_v45  ;;  %v714_v54 = vcombine.low %v691_v48, %v706_v51  ;;  %v715_v55 = vcombine.high %v691_v48, %v706_v51 }
 0x2b3   : > { %v560_v57 = vpop.permute.xlu1 %559 }
 0x2b4   : > { %v722_v58 = vrot.slane %v714_v54, %v2218_v49  ;;  %v729_v59 = vrot.slane %v715_v55, %v2218_v49  ;;  %v730_v60 = vcombine.low %v698_v52, %v713_v53  ;;  %v731_v61 = vcombine.high %v698_v52, %v713_v53 }
 0x2b5   : > { %v577_v63 = vcombine.high %v560_v57, %v2014_v8  ;;  %v584_v0 = vrot.slane %v560_v57, %v2214_v45 }
 0x2b6   : > { %v738_v1 = vrot.slane %v730_v60, %v2218_v49  ;;  %v745_v2 = vrot.slane %v731_v61, %v2218_v49  ;;  %v750_v3 = vcombine.low %v722_v58, %v729_v59  ;;  %v1641_v4 = vcombine.high %v722_v58, %v729_v59 }
 0x2b7   : > { %v591_v6 = vrot.slane %v577_v63, %v2214_v45  ;;  %v592_v7 = vcombine.low %v569_v62, %v584_v0  ;;  %v593_v9 = vcombine.high %v569_v62, %v584_v0 }
 0x2b8   : > { %v766_v10 = vcombine.low %v738_v1, %v745_v2  ;;  %v1642_v11 = vcombine.high %v738_v1, %v745_v2  ;;  %v757_v12 = vrot.slane %v750_v3, %v2214_v45  ;;  %v765_v13 = vrot.slane %v1641_v4, %v2214_v45 }
 0x2b9   : > { %v600_v14 = vrot.slane %v592_v7, %v2218_v49  ;;  %v607_v15 = vrot.slane %v593_v9, %v2218_v49  ;;  %v608_v16 = vcombine.low %v576_v5, %v591_v6  ;;  %v609_v17 = vcombine.high %v576_v5, %v591_v6 }
 0x2ba   : > { %v773_v19 = vrot.slane %v766_v10, %v2214_v45  ;;  %v781_v20 = vrot.slane %v1642_v11, %v2214_v45  ;;  %v782_v21 = vcombine.low %v757_v12, %v765_v13  ;;  %v806_v11 = vcombine.high %v2212_v33, %v2014_v8 }
 0x2bb   : > { %v616_v22 = vrot.slane %v608_v16, %v2218_v49  ;;  %v623_v23 = vrot.slane %v609_v17, %v2218_v49  ;;  %v628_v24 = vcombine.low %v600_v14, %v607_v15  ;;  %v1639_v25 = vcombine.high %v600_v14, %v607_v15 }
 0x2bc   : > { %v790_v26 = vcombine.low %v773_v19, %v781_v20  ;;  %v789_v31 = vrot.slane %v782_v21, %v2218_v49  ;;  %v813_v13 = vrot.slane %v2212_v33, %v2214_v45  ;;  %v820_v16 = vrot.slane %v806_v11, %v2214_v45 }
 0x2bd   : > { %v635_v27 = vrot.slane %v628_v24, %v2214_v45  ;;  %v643_v28 = vrot.slane %v1639_v25, %v2214_v45  ;;  %v644_v29 = vcombine.low %v616_v22, %v623_v23  ;;  %v1640_v30 = vcombine.high %v616_v22, %v623_v23 }
 0x2be   : > { %v797_v32 = vrot.slane %v790_v26, %v2218_v49 }
 0x2bf   : > { %v651_v34 = vrot.slane %v644_v29, %v2214_v45  ;;  %v659_v35 = vrot.slane %v1640_v30, %v2214_v45  ;;  %v660_v36 = vcombine.low %v635_v27, %v643_v28 }
 0x2c0   : > { %v798_v37 = vcombine.low %v789_v31, %v797_v32  ;;  %v799_v38 = vcombine.high %v789_v31, %v797_v32 }
 0x2c1   : > { %v668_v39 = vcombine.low %v651_v34, %v659_v35  ;;  %v667_v46 = vrot.slane %v660_v36, %v2218_v49 }
 0x2c2   : > { %v800_v40 = vpack.c.bf16 %v798_v37, %v798_v37  ;;  %v801_v41 = vpack.c.bf16 %v799_v38, %v799_v38 }
 0x2c3   : > { %v675_v42 = vrot.slane %v668_v39, %v2218_v49 }
 0x2c4   : > { %v929_v43 = vsel %vm924_vm2, %v800_v40, 0  ;;  %v975_v44 = vsel %vm924_vm2, %v801_v41, 0 }
 0x2c5   : > { %1729 = vmatpush3.bf16.xpose.msra.mxu1 %v929_v43  ;;  %1735 = vmatpush3.bf16.xpose.msra.mxu0 %v975_v44  ;;  %v676_v47 = vcombine.low %v667_v46, %v675_v42  ;;  %v677_v48 = vcombine.high %v667_v46, %v675_v42 }
 0x2c6   : > { %1740 = vmatprep.subr.bf16.mxu1 %v2014_v8  ;;  %1746 = vmatprep.subr.bf16.mxu0 %v2014_v8 }
 0x2c7   : > { %v678_v50 = vpack.c.bf16 %v676_v47, %v676_v47  ;;  %v679_v51 = vpack.c.bf16 %v677_v48, %v677_v48 }
 0x2cc   : > { %1731 = vmatmul.mubr.msk.bf16.vlgmr.msra.gmra.mxu1 %vm924_vm2, %v678_v50  ;;  %1737 = vmatmul.mubr.msk.bf16.vlgmr.msra.gmra.mxu0 %vm924_vm2, %v679_v51 }
 0x2cd   : > { %1742 = vmatprep.mubr.msk.bf16.mxu1 %vm2015_vm1, %v2014_v8  ;;  %1748 = vmatprep.mubr.msk.bf16.mxu0 %vm2015_vm1, %v2014_v8 }
 0x38c   : > { %v965_v52 = vpop.f32.mrf.mxu1  ;;  %v1011_v53 = vpop.f32.mrf.mxu0 }
 0x38d   : > { %v1018_v54 = vsel %vm1017_vm3, %v965_v52, -inf  ;;  %v1021_v55 = vsel %vm1017_vm3, %v1011_v53, -inf }
 0x38e   : > { %1019 = vmax.xlane.f32.xlu0 %v1018_v54  ;;  %v1732_v56 = vpop.f32.mrf.mxu1  ;;  %1022 = vmax.xlane.f32.xlu1 %v1021_v55  ;;  %v1738_v57 = vpop.f32.mrf.mxu0 }
 0x390   : > { %v968_v58 = vpop.f32.mrf.mxu1  ;;  %v1014_v59 = vpop.f32.mrf.mxu0 }
 0x392   : > { %v1733_v60 = vpop.f32.mrf.mxu1  ;;  %v1739_v61 = vpop.f32.mrf.mxu0 }
 0x417   : > { %v1020_v62 = vpop.xlane.xlu0 %1019  ;;  %v1023_v63 = vpop.xlane.xlu1 %1022 }
 0x418   : > { %v1024_v0 = vsub.f32 %v965_v52, %v1020_v62  ;;  %v1025_v1 = vsub.f32 %v1011_v53, %v1023_v63  ;;  %v1862_v53 = vld [vmem:[%s2411_s5 + $0x8] sm:$0xff]  }
 0x41a   : > { %v1026_v2 = vmul.f32 1.442695, %v1024_v0  ;;  %v1028_v3 = vmul.f32 1.442695, %v1025_v1 }
 0x41c   : > { %1876 = vpow2.f32 %v1026_v2 }
 0x41d   : > { %1878 = vpow2.f32 %v1028_v3 }
 0x429   : > { %v1877_v4 = vpop.eup %1876 }
 0x42a   : > { %v1030_v5 = vsel %vm1017_vm3, %v1877_v4, 0.0  ;;  %v1879_v6 = vpop.eup %1878 }
 0x42b   : > { %1031 = vadd.xlane.f32.xlu0 %v1030_v5  ;;  %v1033_v7 = vsel %vm1017_vm3, %v1879_v6, 0.0 }
 0x42f   : > { %1034 = vadd.xlane.f32.xlu0 %v1033_v7 }
 0x445   : > { %803 = vrot.lane.b32.xlu0 %v2212_v33, %s2016_s28  ;;  %s349_s28 = sand.u32 1, %s2000_s10  }
 0x446   : > { %s1626_s29 = sshll.u32 %s349_s28, 3  ;;  %s1524_s25 = scalar_lea.sflag [#allocation4], %s349_s28 }
 0x447   : > { %s351_s16 = scalar_lea.vmem [#allocation7], %s1626_s29 }
 0x448   : > { %s1537_s17 = sshll.u32 %s351_s16, 4  ;;  %s2366_s17 = int_to_ptr.vmem [resolvable:$true] %s1537_s17 }
 0x449   : > { %s1940_s13 = scalar_lea.vmem %s2366_s17, 128  ;;  %p1947_p8 = scmp.lt.s32.totalorder %s2366_s17, %s1945_s21 }
 0x44a   : > { %p1941_p12 = scmp.ne.s32.totalorder %s2366_s17, %s1940_s13  ;;  %p1948_p11 = scmp.lt.s32.totalorder %s1946_s27, %s1940_s13 }
 0x44c   : > { %p1942_p4 = pnand %p1941_p12, %p2428_p13  ;;  %p1949_p0 = por %p1948_p11, %p1947_p8 }
 0x44e   : > { %p1943_p7 = pneg %p1942_p4 }
 0x450   : > { %p1950_p1 = pnand %p1949_p0, %p1943_p7 }
 0x4b4   : > { %v1032_v9 = vpop.xlane.xlu0 %1031 }
 0x4b5   : > { %1880 = vrcp.f32 %v1032_v9  ;;  %v1863_v9 = vld [vmem:[%s2411_s5] sm:$0xff]  }
 0x4b8   : > { %v1035_v10 = vpop.xlane.xlu0 %1034 }
 0x4b9   : > { %1882 = vrcp.f32 %v1035_v10 }
 0x4bc   : > { %v804_v12 = vpop.permute.xlu0 %803 }
 0x4bd   : > { %v821_v14 = vcombine.high %v804_v12, %v2014_v8  ;;  %v828_v15 = vrot.slane %v804_v12, %v2214_v45 }
 0x4bf   : > { %v835_v17 = vrot.slane %v821_v14, %v2214_v45  ;;  %v836_v19 = vcombine.low %v813_v13, %v828_v15  ;;  %v837_v20 = vcombine.high %v813_v13, %v828_v15 }
 0x4c1   : > { %v844_v21 = vrot.slane %v836_v19, %v2218_v49  ;;  %v851_v22 = vrot.slane %v837_v20, %v2218_v49  ;;  %v852_v23 = vcombine.low %v820_v16, %v835_v17  ;;  %v853_v24 = vcombine.high %v820_v16, %v835_v17 }
 0x4c2   : > { %v1881_v37 = vpop.eup %1880 }
 0x4c3   : > { %v860_v33 = vrot.slane %v852_v23, %v2218_v49  ;;  %v867_v25 = vrot.slane %v853_v24, %v2218_v49  ;;  %v872_v26 = vcombine.low %v844_v21, %v851_v22  ;;  %v1643_v27 = vcombine.high %v844_v21, %v851_v22 }
 0x4c4   : > { %v1038_v46 = vmul.f32 %v1881_v37, %v1877_v4 }
 0x4c5   : > { %v879_v28 = vrot.slane %v872_v26, %v2214_v45  ;;  %v887_v29 = vrot.slane %v1643_v27, %v2214_v45  ;;  %v888_v30 = vcombine.low %v860_v33, %v867_v25  ;;  %v1644_v31 = vcombine.high %v860_v33, %v867_v25 }
 0x4c6   : > { %v1883_v40 = vpop.eup %1882  ;;  %v1040_v51 = vpack.c.bf16 %v1038_v46, %v1038_v46 }
 0x4c7   : > { %v895_v32 = vrot.slane %v888_v30, %v2214_v45  ;;  %v903_v34 = vrot.slane %v1644_v31, %v2214_v45  ;;  %v904_v35 = vcombine.low %v879_v28, %v887_v29  ;;  %v1039_v47 = vmul.f32 %v1883_v40, %v1879_v6 }
 0x4c9   : > { %v912_v36 = vcombine.low %v895_v32, %v903_v34  ;;  %v911_v38 = vrot.slane %v904_v35, %v2218_v49  ;;  %v1041_v52 = vpack.c.bf16 %v1039_v47, %v1039_v47  ;;  %v1654_v47 = vld [vmem:[#allocation2 + $0x2] ss:$0 sm:$0xff] }
 0x4cb   : > { %v919_v39 = vrot.slane %v912_v36, %v2218_v49 }
 0x4cd   : > { %v920_v41 = vcombine.low %v911_v38, %v919_v39  ;;  %v921_v42 = vcombine.high %v911_v38, %v919_v39 }
 0x4cf   : > { %v922_v43 = vpack.c.bf16 %v920_v41, %v920_v41  ;;  %v923_v44 = vpack.c.bf16 %v921_v42, %v921_v42  ;;  %v1864_v41 = vld [vmem:[#allocation5 + $0x8] sm:$0xff]   ;;  %v1865_v42 = vld [vmem:[#allocation5] sm:$0xff]  }
 0x4d1   : > { %v1047_v48 = vsel %vm1045_vm4, %v922_v43, 0  ;;  %v1093_v50 = vsel %vm1045_vm4, %v923_v44, 0 }
 0x4d2   : > { %1741 = vmatpush3.bf16.msra.mxu1 %v1047_v48  ;;  %1747 = vmatpush3.bf16.msra.mxu0 %v1093_v50  ;;  %v1655_v50 = vld [vmem:[#allocation2 + $0x3] ss:$0 sm:$0xff] }
 0x4d3   : > { %1752 = vmatprep.subr.bf16.mxu1 %v2014_v8  ;;  %1760 = vmatprep.subr.bf16.mxu0 %v2014_v8 }
 0x4d5   : > { %1743 = vmatmul.mubr.msk.bf16.vlgmr.msra.gmra.mxu1 %vm1017_vm3, %v1040_v51  ;;  %1749 = vmatmul.mubr.msk.bf16.vlgmr.msra.gmra.mxu0 %vm1017_vm3, %v1041_v52 }
 0x4d6   : > { %1756 = vmatprep.mubr.msk.bf16.mxu1 %vm2015_vm1, %v2014_v8  ;;  %1764 = vmatprep.mubr.msk.bf16.mxu0 %vm2015_vm1, %v2014_v8 }
 0x4d7   : > { %1753 = vmatpush3.bf16.msra.mxu1 %v1862_v53  ;;  %1761 = vmatpush3.bf16.msra.mxu0 %v1864_v41 }
 0x4d8   : > { %1754 = vmatprep.subr.bf16.mxu1 %v2014_v8  ;;  %1762 = vmatprep.subr.bf16.mxu0 %v2014_v8 }
 0x4db   : > { %1755 = vmatpush3.bf16.msra.mxu1 %v1863_v9  ;;  %1763 = vmatpush3.bf16.msra.mxu0 %v1865_v42 }
 0x4dc   : > { %1768 = vmatprep.subr.bf16.mxu1 %v2014_v8 }
 0x595   : > { %v1083_v54 = vpop.f32.mrf.mxu1  ;;  %v1129_v55 = vpop.f32.mrf.mxu0 }
 0x596   : > { %v1135_v56 = vcombine.high %v1083_v54, %v2014_v8  ;;  %v1142_v57 = vrot.slane %v1083_v54, %v2214_v45  ;;  %v1150_v58 = vcombine.high %v1129_v55, %v2014_v8  ;;  %v1157_v59 = vrot.slane %v1129_v55, %v2214_v45  ;;  %v1866_v54 = vld [vmem:[%s2414_s8 + $0x38] sm:$0xff]   ;;  %v1867_v55 = vld [vmem:[%s2414_s8 + $0x30] sm:$0xff]  }
 0x597   : > { %v1744_v60 = vpop.f32.mrf.mxu1  ;;  %v1750_v61 = vpop.f32.mrf.mxu0 }
 0x598   : > { %v1149_v62 = vrot.slane %v1135_v56, %v2214_v45  ;;  %v1164_v63 = vrot.slane %v1150_v58, %v2214_v45  ;;  %v1165_v0 = vcombine.low %v1142_v57, %v1157_v59  ;;  %v1166_v1 = vcombine.high %v1142_v57, %v1157_v59  ;;  %v1868_v56 = vld [vmem:[%s2414_s8 + $0x28] sm:$0xff]   ;;  %v1869_v57 = vld [vmem:[%s2414_s8 + $0x20] sm:$0xff]   ;;  %v1870_v58 = vld [vmem:[%s2414_s8 + $0x18] sm:$0xff]  }
 0x599   : > { %v1086_v2 = vpop.f32.mrf.mxu1  ;;  %v1132_v3 = vpop.f32.mrf.mxu0  ;;  %v1871_v59 = vld [vmem:[%s2414_s8 + $0x10] sm:$0xff]   ;;  %v1872_v60 = vld [vmem:[%s2414_s8 + $0x8] sm:$0xff]   ;;  %v1873_v61 = vld [vmem:[%s2414_s8] sm:$0xff]  }
 0x59a   : > { %v1173_v4 = vrot.slane %v1165_v0, %v2218_v49  ;;  %v1180_v5 = vrot.slane %v1166_v1, %v2218_v49  ;;  %v1181_v6 = vcombine.low %v1149_v62, %v1164_v63  ;;  %v1182_v7 = vcombine.high %v1149_v62, %v1164_v63  ;;  %v1656_v62 = vld [vmem:[%s2413_s7] ss:$0 sm:$0xff] }
 0x59b   : > { %v1745_v10 = vpop.f32.mrf.mxu1  ;;  %v1751_v11 = vpop.f32.mrf.mxu0 }
 0x59c   : > { %v1189_v12 = vrot.slane %v1181_v6, %v2218_v49  ;;  %v1196_v13 = vrot.slane %v1182_v7, %v2218_v49  ;;  %v1201_v14 = vcombine.low %v1173_v4, %v1180_v5  ;;  %v1649_v15 = vcombine.high %v1173_v4, %v1180_v5 }
 0x59e   : > { %v1208_v16 = vrot.slane %v1201_v14, %v2214_v45  ;;  %v1216_v17 = vrot.slane %v1649_v15, %v2214_v45  ;;  %v1217_v19 = vcombine.low %v1189_v12, %v1196_v13  ;;  %v1650_v20 = vcombine.high %v1189_v12, %v1196_v13 }
 0x5a0   : > { %v1224_v21 = vrot.slane %v1217_v19, %v2214_v45  ;;  %v1232_v22 = vrot.slane %v1650_v20, %v2214_v45  ;;  %v1233_v23 = vcombine.low %v1208_v16, %v1216_v17 }
 0x5a2   : > { %v1241_v24 = vcombine.low %v1224_v21, %v1232_v22  ;;  %v1240_v33 = vrot.slane %v1233_v23, %v2218_v49 }
 0x5a4   : > { %v1248_v25 = vrot.slane %v1241_v24, %v2218_v49 }
 0x5a6   : > { %v1250_v26 = vcombine.high %v1240_v33, %v1248_v25  ;;  %v1249_v27 = vcombine.low %v1240_v33, %v1248_v25 }
 0x5a8   : > { %1252 = vrot.lane.b32.xlu0 %v1250_v26, %s2019_s22 }
 0x61a   : > { %v1253_v28 = vpop.permute.xlu0 %1252 }
 0x61b   : > { %v1255_v29 = vsel %vm924_vm2, %v1249_v27, %v1253_v28 }
 0x61c   : > { %v1256_v30 = vpack.c.bf16 %v1255_v29, %v1255_v29 }
 0x61e   : > { %1757 = vmatmul.mubr.msk.bf16.vlgmr.msra.gmra.mxu1 %vm360_vm0, %v1256_v30 }
 0x61f   : > { %1784 = vmatprep.mubr.msk.bf16.mxu1 %vm2015_vm1, %v2014_v8  ;;  %1769 = vmatpush3.bf16.msra.mxu1 %v1866_v54 }
 0x620   : > { %1770 = vmatprep.subr.bf16.mxu1 %v2014_v8 }
 0x623   : > { %1771 = vmatpush3.bf16.msra.mxu1 %v1867_v55 }
 0x624   : > { %1772 = vmatprep.subr.bf16.mxu1 %v2014_v8 }
 0x627   : > { %1773 = vmatpush3.bf16.msra.mxu1 %v1868_v56 }
 0x628   : > { %1774 = vmatprep.subr.bf16.mxu1 %v2014_v8 }
 0x62b   : > { %1775 = vmatpush3.bf16.msra.mxu1 %v1869_v57 }
 0x62c   : > { %1776 = vmatprep.subr.bf16.mxu1 %v2014_v8 }
 0x62f   : > { %1777 = vmatpush3.bf16.msra.mxu1 %v1870_v58 }
 0x630   : > { %1778 = vmatprep.subr.bf16.mxu1 %v2014_v8 }
 0x633   : > { %1779 = vmatpush3.bf16.msra.mxu1 %v1871_v59 }
 0x634   : > { %1780 = vmatprep.subr.bf16.mxu1 %v2014_v8 }
 0x637   : > { %1781 = vmatpush3.bf16.msra.mxu1 %v1872_v60 }
 0x638   : > { %1782 = vmatprep.subr.bf16.mxu1 %v2014_v8 }
 0x63b   : > { %1783 = vmatpush3.bf16.msra.mxu1 %v1873_v61 }
 0x6de   : > { %v1310_v45 = vpop.f32.mrf.mxu1 }
 0x6df   : > { %v1311_v31 = vadd.f32 %v1310_v45, %v2181_v18 }
 0x6e0   : > { %v1758_v32 = vpop.f32.mrf.mxu1 }
 0x6e1   : > { %v1318_v34 = vsel %vm360_vm0, %v1311_v31, 0.0 }
 0x6e2   : > { %1319 = vadd.xlane.f32.xlu1 %v1318_v34  ;;  %v1313_v49 = vpop.f32.mrf.mxu1 }
 0x6e4   : > { %v1759_v35 = vpop.f32.mrf.mxu1 }
 0x76b   : > { %v1320_v36 = vpop.xlane.xlu1 %1319 }
 0x76c   : > { %v1321_v37 = vmul.f32 0.03125, %v1320_v36 }
 0x76e   : > { %v1322_v38 = vsub.f32 %v1311_v31, %v1321_v37 }
 0x770   : > { %v1323_v39 = vmul.f32 %v1322_v38, %v1322_v38 }
 0x772   : > { %v1324_v40 = vsel %vm360_vm0, %v1323_v39, 0.0 }
 0x773   : > { %1325 = vadd.xlane.f32.xlu0 %v1324_v40 }
 0x7fc   : > { %v1326_v18 = vpop.xlane.xlu0 %1325 }
 0x7fd   : > { %v1327_v43 = vmul.f32 0.03125, %v1326_v18 }
 0x7ff   : > { %v1328_v44 = vadd.f32 1e-05, %v1327_v43 }
 0x801   : > { %1884 = vrsqrt.f32 %v1328_v44 }
 0x80e   : > { %v1885_v46 = vpop.eup %1884 }
 0x80f   : > { %v1330_v48 = vmul.f32 %v1885_v46, %v1322_v38 }
 0x811   : > { %v1335_v51 = vmul.f32 %v1654_v47, %v1330_v48 }
 0x813   : > { %v1340_v52 = vadd.f32 %v1655_v50, %v1335_v51 }
 0x815   : > { %v1341_v53 = vpack.c.bf16 %v1340_v52, %v1340_v52 }
 0x817   : > { %1765 = vmatmul.mubr.msk.bf16.vlgmr.msra.gmra.mxu0 %vm360_vm0, %v1341_v53 }
 0x8d7   : > { %v1402_v63 = vpop.f32.mrf.mxu0 }
 0x8d8   : > { %v1403_v0 = vadd.f32 %v1656_v62, %v1402_v63 }
 0x8d9   : > { %v1766_v1 = vpop.f32.mrf.mxu0 }
 0x8da   : > { %v1408_v2 = vmul.f32 %v1403_v0, %v1403_v0 }
 0x8db   : > { %v1405_v3 = vpop.f32.mrf.mxu0 }
 0x8dc   : > { %v1409_v4 = vmul.f32 %v1408_v2, %v1403_v0 }
 0x8dd   : > { %v1767_v5 = vpop.f32.mrf.mxu0 }
 0x8de   : > { %v1410_v6 = vmul.f32 0.044715, %v1409_v4 }
 0x8e0   : > { %v1411_v7 = vadd.f32 %v1410_v6, %v1403_v0 }
 0x8e2   : > { %v1412_v9 = vmul.f32 0.7978846, %v1411_v7 }
 0x8e4   : > { %1886 = vtanh.f32 %v1412_v9 }
 0x8f1   : > { %v1887_v10 = vpop.eup %1886 }
 0x8f2   : > { %v1414_v8 = vadd.f32 1.0, %v1887_v10 }
 0x8f4   : > { %v1415_v11 = vmul.f32 0.5, %v1414_v8 }
 0x8f6   : > { %v1416_v12 = vmul.f32 %v1415_v11, %v1403_v0 }
 0x8f8   : > { %v1417_v13 = vpack.c.bf16 %v1416_v12, %v1416_v12 }
 0x8fa   : > { %1785 = vmatmul.mubr.bf16.vlgmr.msra.gmra.mxu1 %v1417_v13 }
 0x9ba   : > { %v1516_v14 = vpop.f32.mrf.mxu1 }
 0x9bb   : > { %v1517_v15 = vadd.f32 %v1516_v14, %v1340_v52 }
 0x9bc   : > { %v1786_v16 = vpop.f32.mrf.mxu1 }
 0x9bd   : > { %1522 = vst.msk [vmem:[%s351_s16] sm:$0xff] %vm360_vm0, %v1517_v15 }
 0x9be   : > { %v1519_v17 = vpop.f32.mrf.mxu1 }
 0x9bf   : > { %1953 = shalt.err (!%p1950_p1)
}
 0x9c0   : > { %s1954_s29 = scalar_lea.hbm %s2364_s23, 128  ;;  %s1958_s16 = scalar_lea.hbm %s2415_s9, 256 }
 0x9c1   : > { %p1955_p2 = scmp.ne.s32.totalorder %s2364_s23, %s1954_s29  ;;  %p1959_p5 = scmp.lt.s32.totalorder %s2364_s23, %s2415_s9 }
 0x9c2   : > { %p1960_p6 = scmp.lt.s32.totalorder %s1958_s16, %s1954_s29 }
 0x9c3   : > { %p1956_p3 = pnand %p1955_p2, %p2428_p13 }
 0x9c4   : > { %p1961_p10 = por %p1960_p6, %p1959_p5 }
 0x9c5   : > { %p1957_p9 = pneg %p1956_p3 }
 0x9c7   : > { %p1962_p12 = pnand %p1961_p10, %p1957_p9 }
 0x9c9   : > { %1965 = shalt.err (!%p1962_p12)
}
 0x9ca   : > { %1796 = dma.vmem_to_hbm [thread:$0]  (%p2428_p13), %s2366_s17, 128, %s2364_s23, %s1524_s25   ;;  %v1787_v19 = vpop.f32.mrf.mxu1 }
 0x9cb PF: > { %p1813_p4 = scmp.ge.s32.totalorder %s2008_s12, 2  ;;  %s1549_s13 = sand.u32 1, %s1996_s30  }
 0x9cc   : > { %p2429_p7 = scmp.ne.s32.totalorder %s2420_s20, 0  ;;  %s1550_s26 = scalar_lea.sflag [#allocation4], %s1549_s13 }
 0x9ce   : > { %p1806_p8 = pnand %p1813_p4, %p2429_p7 }
 0x9d0   : > { %p1807_p11 = pneg %p1806_p8 }
 0x9d2   : > { %1991 = dma.done.wait (%p1807_p11), %s1550_s26, 128  }
 0x9d3   : > { %1993 = vsyncadd (%p1807_p11), %s1550_s26, 4294967168  ;;  %p21_p0 = scmp.ge.s32.totalorder %s2096_s15, 4   ;;  %s2430_s30 = smov %s2000_s10 }
 0x9d4   : > { %s2431_s10 = smov %s2004_s11  ;;  %s2432_s11 = smov %s2107_s18 }
 0x9d5   : > { %s2433_s12 = smov %s2096_s15  ;;  %23 = sbr.rel (!%p21_p0) target bundleno = 5 (0x5), region = 100 }
 0x9da   :  { %1555 = vsyncpa [#allocation3], 1 }
 0x9db   :  { %1557 = vsyncpa [#allocation3 + $0x1], 1 }
 0x9dc   :  { %1558 = vsyncpa [#allocation6], 1 }
 0x9dd   :  { %1559 = vsyncpa [#allocation4], 1 }
 0x9de   :  { %1561 = vsyncpa [#allocation4 + $0x1], 1 }

</bundles_post_ra>
